<compile_context>
chip_gen: v6e
topology: v6e:2x2x1
jax: 0.10.0
libtpu: 0.0.40
codegen_flags: <defaults>
</compile_context>

<pallas_src>
import math
import functools

import jax
import jax.numpy as jnp
import numpy as np
from jax import lax
from jax.experimental import pallas as pl
from jax.experimental.pallas import tpu as pltpu

LENGTH = 9984


# ---------------------------------------------------------------------------
# Parameter / buffer setup (plain JAX, mirrors nn.Module.__init__)
# ---------------------------------------------------------------------------
def make_positional_encoding_buffer(d_model: int, max_len: int = LENGTH) -> jnp.ndarray:
    """Builds the `pe` buffer exactly like the PyTorch __init__ does."""
    position = jnp.arange(max_len, dtype=jnp.float32)[:, None]                 # [max_len, 1]
    div_term = jnp.exp(
        jnp.arange(0, d_model, 2, dtype=jnp.float32) * (-math.log(10000.0) / d_model)
    )                                                                          # [d_model/2]
    angles = position * div_term                                               # [max_len, d_model/2]
    pe = jnp.zeros((max_len, 1, d_model), dtype=jnp.float32)
    pe = pe.at[:, 0, 0::2].set(jnp.sin(angles))
    pe = pe.at[:, 0, 1::2].set(jnp.cos(angles))
    return pe


# ---------------------------------------------------------------------------
# Tile-size / VMEM-budget selection (generation-aware)
# ---------------------------------------------------------------------------
def _round_up(n: int, m: int) -> int:
    return ((n + m - 1) // m) * m


def _vmem_budget():
    """Returns (vmem_limit_bytes, per-step block budget in bytes)."""
    cap = 64 * 1024 * 1024  # conservative fallback = v7x physical VMEM
    try:
        info = pltpu.get_tpu_info()
        cap = int(getattr(info, "vmem_capacity_bytes", cap))
    except Exception:
        pass
    vmem_limit = int(cap * 0.7)          # ~45 MiB on v7x, ~90 MiB on v5e/v6e
    block_budget = int(vmem_limit * 0.8)  # headroom for compiler scratch
    return vmem_limit, block_budget


def _choose_tiles(S: int, B: int, D: int, itemsize: int, block_budget: int):
    """Pick (seq tile, batch chunk) so double-buffered blocks fit the budget."""

    def step_bytes(tile, bc):
        # double-buffered: x-in block + out block + pe block
        return 2 * (2 * tile * bc * D + tile * D) * itemsize

    # Prefer the whole batch per block (lane dim == full B*D); shrink only if
    # even an 8-row tile would not fit, and only to lane-aligned chunks.
    bc = B
    if step_bytes(8, B) > block_budget:
        for cand in range(B - 1, 0, -1):
            if B % cand == 0 and (cand * D) % 128 == 0 and step_bytes(8, cand) <= block_budget:
                bc = cand
                break

    if S < 8:
        return S, bc  # block dim equals full seq dim

    max_tile = min(2048, _round_up(S, 8))
    tile = 8
    while tile * 2 <= max_tile and step_bytes(tile * 2, bc) <= block_budget:
        tile *= 2
    return tile, bc


# ---------------------------------------------------------------------------
# Pallas kernel: add positional encoding + (optional) dropout
# ---------------------------------------------------------------------------
def _pe_dropout_kernel(seed_ref, x_ref, pe_ref, o_ref, *,
                       p: float, training: bool, bc: int,
                       n_cols_total: int, cols_per_block: int, tile_s: int):
    # x_ref : (tile_s, bc*D)  block of the collapsed [S, B*D] input
    # pe_ref: (tile_s, D)     block of the pe buffer
    pe_blk = pe_ref[...]
    if bc > 1:
        pe_blk = jnp.tile(pe_blk, (1, bc))      # lane-replicate across the batch chunk
    y = x_ref[...] + pe_blk

    if training and p > 0.0:
        # Portable counter-based PRNG: hash(seed, global element index).
        # Order-independent -> safe with "parallel" grid semantics.
        shape = y.shape
        row0 = pl.program_id(0) * tile_s
        col0 = pl.program_id(1) * cols_per_block
        rows = lax.broadcasted_iota(jnp.int32, shape, 0) + row0
        cols = lax.broadcasted_iota(jnp.int32, shape, 1) + col0
        idx = rows * jnp.int32(n_cols_total) + cols
        h = idx.astype(jnp.uint32)
        h = h ^ (seed_ref[0].astype(jnp.uint32) * jnp.uint32(0x9E3779B9))
        # lowbias32 finalizer (cheap VPU ops: xor/shift/mul)
        h = h ^ (h >> 16)
        h = h * jnp.uint32(0x7FEB352D)
        h = h ^ (h >> 15)
        h = h * jnp.uint32(0x846CA68B)
        h = h ^ (h >> 16)
        # integer-threshold keep test: P(drop) = p, no float conversion needed
        thresh = jnp.uint32(min(int(round(p * 4294967296.0)), 4294967295))
        keep = h >= thresh
        scale = jnp.asarray(1.0 / (1.0 - p), dtype=y.dtype)
        y = jnp.where(keep, y * scale, jnp.zeros_like(y))

    o_ref[...] = y.astype(o_ref.dtype)


def positional_encoding_forward(
    x: jnp.ndarray,
    pe: jnp.ndarray,
    *,
    p: float = 0.1,
    training: bool = False,
    seed: int = 0,
) -> jnp.ndarray:
    """x: [seq_len, batch, d_model] -> [seq_len, batch, d_model]."""
    S, B, D = x.shape
    max_len = pe.shape[0]
    assert S <= max_len and pe.shape[1:] == (1, D)

    # Free, contiguous layout changes: x -> [S, B*D]; pe -> [max_len, D] in x's dtype.
    x2d = x.reshape(S, B * D)
    pe2d = pe[:, 0, :].astype(x.dtype)

    itemsize = x.dtype.itemsize
    vmem_limit, block_budget = _vmem_budget()
    tile_s, bc = _choose_tiles(S, B, D, itemsize, block_budget)

    cols_per_block = bc * D
    n_cols_total = B * D
    grid = (pl.cdiv(S, tile_s), B // bc)

    kernel = functools.partial(
        _pe_dropout_kernel,
        p=float(p), training=bool(training), bc=bc,
        n_cols_total=n_cols_total, cols_per_block=cols_per_block, tile_s=tile_s,
    )
    seed_arr = jnp.asarray([seed], dtype=jnp.int32)

    cost = pl.CostEstimate(
        flops=2 * S * B * D,
        transcendentals=0,
        bytes_accessed=2 * S * B * D * itemsize + S * D * itemsize,
    )

    out2d = pl.pallas_call(
        kernel,
        out_shape=jax.ShapeDtypeStruct((S, B * D), x.dtype),
        grid_spec=pltpu.PrefetchScalarGridSpec(
            num_scalar_prefetch=1,
            grid=grid,
            in_specs=[
                pl.BlockSpec((tile_s, cols_per_block), lambda i, j, seed: (i, j)),  # x slab
                pl.BlockSpec((tile_s, D), lambda i, j, seed: (i, 0)),               # pe slice
            ],
            out_specs=pl.BlockSpec((tile_s, cols_per_block), lambda i, j, seed: (i, j)),
        ),
        compiler_params=pltpu.CompilerParams(
            dimension_semantics=("parallel", "parallel"),  # order-independent; lets v7x megacore shard
            vmem_limit_bytes=vmem_limit,
        ),
        cost_estimate=cost,
    )(seed_arr, x2d, pe2d)

    return out2d.reshape(S, B, D)


# ---------------------------------------------------------------------------
# Demo / self-check
# ---------------------------------------------------------------------------
if __name__ == "__main__":
    key = jax.random.PRNGKey(0)

    seq_len, batch, d_model = 8, 2, 32
    x = jax.random.normal(key, (seq_len, batch, d_model), dtype=jnp.float32)
    pe = make_positional_encoding_buffer(d_model, max_len=LENGTH)

    # Eval mode (dropout is identity) -> deterministic, check against reference.
    y_eval = positional_encoding_forward(x, pe, p=0.1, training=False)
    y_eval = jax.block_until_ready(y_eval)
    ref = x + pe[:seq_len]
    np.testing.assert_allclose(np.asarray(y_eval), np.asarray(ref), rtol=1e-6, atol=1e-6)

    # Eval mode with a seq length that does not divide the tile (tail masking path).
    seq2 = 20
    x2 = jax.random.normal(jax.random.PRNGKey(1), (seq2, batch, d_model), dtype=jnp.float32)
    y2 = jax.block_until_ready(positional_encoding_forward(x2, pe, p=0.1, training=False))
    ref2 = x2 + pe[:seq2]
    np.testing.assert_allclose(np.asarray(y2), np.asarray(ref2), rtol=1e-6, atol=1e-6)

    # Training mode (in-kernel hash-PRNG dropout) -> each element must be either
    # 0 (dropped) or (x + pe) / (1 - p) (kept & rescaled).
    drop_p = 0.1
    y_train = positional_encoding_forward(x, pe, p=drop_p, training=True, seed=1234)
    y_train = jax.block_until_ready(y_train)
    assert y_train.shape == x.shape and y_train.dtype == x.dtype
    yt = np.asarray(y_train)
    scaled = np.asarray(ref) / (1.0 - drop_p)
    ok = np.isclose(yt, 0.0, atol=1e-6) | np.isclose(yt, scaled, rtol=1e-5, atol=1e-5)
    assert np.all(ok), "dropout output must be 0 or rescaled (x + pe)"

    print("KERNEL_OK")
</pallas_src>

<mosaic_0001>
module attributes {stable_mosaic.version = 11 : i64} {
  func.func @_pe_dropout_kernel(%arg0: i32, %arg1: i32, %arg2: memref<1xi32, #tpu.memory_space<smem>>, %arg3: memref<8x64xf32, #tpu.memory_space<vmem>>, %arg4: memref<8x32xf32, #tpu.memory_space<vmem>>, %arg5: memref<8x64xf32, #tpu.memory_space<vmem>>) attributes {dimension_semantics = [#tpu.dimension_semantics<parallel>, #tpu.dimension_semantics<parallel>], iteration_bounds = array<i64: 1, 1>, scalar_prefetch = 1 : i64, scratch_operands = 0 : i64, tpu.core_type = #tpu.core_type<tc>, window_params = [{transform_indices = @transform_0, window_bounds = array<i64: 8, 64>}, {transform_indices = @transform_1, window_bounds = array<i64: 8, 32>}, {transform_indices = @transform_2, window_bounds = array<i64: 8, 64>}]} {
    %c0 = arith.constant 0 : index
    %c0_0 = arith.constant 0 : index
    %0 = vector.load %arg4[%c0, %c0_0] : memref<8x32xf32, #tpu.memory_space<vmem>>, vector<8x32xf32>
    %1 = tpu.concatenate %0, %0 in 1 : vector<8x32xf32>, vector<8x32xf32> -> vector<8x64xf32>
    %c0_1 = arith.constant 0 : index
    %c0_2 = arith.constant 0 : index
    %2 = vector.load %arg3[%c0_1, %c0_2] : memref<8x64xf32, #tpu.memory_space<vmem>>, vector<8x64xf32>
    %3 = arith.addf %2, %1 : vector<8x64xf32>
    %c0_3 = arith.constant 0 : index
    %c0_4 = arith.constant 0 : index
    %4 = vector.load %arg5[%c0_3, %c0_4] : memref<8x64xf32, #tpu.memory_space<vmem>>, vector<8x64xf32>
    tpu.vector_store %arg5[%c0_3, %c0_4], %3 {strides = array<i32>} : memref<8x64xf32, #tpu.memory_space<vmem>>, vector<8x64xf32>,
    return
  }
  func.func @transform_0(%arg0: i32, %arg1: i32, %arg2: memref<1xi32, #tpu.memory_space<smem>>) -> (i32, i32) {
    %c0_i32 = arith.constant 0 : i32
    return %arg0, %arg1 : i32, i32
  }
  func.func @transform_1(%arg0: i32, %arg1: i32, %arg2: memref<1xi32, #tpu.memory_space<smem>>) -> (i32, i32) {
    %c0_i32 = arith.constant 0 : i32
    %c0_i32_0 = arith.constant 0 : i32
    return %arg0, %c0_i32 : i32, i32
  }
  func.func @transform_2(%arg0: i32, %arg1: i32, %arg2: memref<1xi32, #tpu.memory_space<smem>>) -> (i32, i32) {
    %c0_i32 = arith.constant 0 : i32
    return %arg0, %arg1 : i32, i32
  }
}

</mosaic_0001>

<bundles_post_ra>
// kernel: tpu_custom_call.1
= control target key start
LH: loop header
LB: loop body
LE: loop exit
PB: predicated region body
PF: predicated region fallthrough
CT: control target
= control target key end

     0   :  { %s94_s0 = inlined_call_operand.<no memory space> [shape: s32[1], index: 0, kind: input, shape index: {}]   ;;  %s95_s1 = inlined_call_operand.vmem [shape: f32[8,64], index: 1, kind: input, shape index: {}]   ;;  %s96_s2 = inlined_call_operand.vmem [shape: f32[9984,32], index: 2, kind: input, shape index: {}]   ;;  %s97_s3 = inlined_call_operand.hbm [shape: f32[8,64], index: 3, kind: output, shape index: {}]  }
   0x1   :  { %v14_v0 = vld [vmem:[%s96_s2] sm:$0xff] }
   0x2   :  { %9 = vsyncpa [#allocation5], 0  ;;  %s63_s14 = smov 32   ;;  %vm19_vm0 = vcmask 261120   ;;  %v21_v1 = vld [vmem:[%s95_s1] sm:$0xff]  ;;  %s64_s0 = smov [#allocation4]  }
   0x3   :  { %16 = vrot.lane.b32.xlu0 %v14_v0, %s63_s14  ;;  %s31_s17 = sshll.u32 %s64_s0, 4  ;;  %vm23_vm1 = vcmask 523264   ;;  %s32_s17 = int_to_ptr.vmem [resolvable:$true] %s31_s17 }
   0x4   :  { %s41_s18 = scalar_lea.vmem %s32_s17, 128  ;;  %p46_p1 = scmp.lt.s32.totalorder %s32_s17, %s32_s17 }
   0x5   :  { %p42_p0 = scmp.ne.s32.totalorder %s32_s17, %s41_s18  ;;  %p47_p2 = scmp.lt.s32.totalorder %s41_s18, %s41_s18 }
   0x7   :  { %p48_p3 = por %p47_p2, %p46_p1 }
   0x9   :  { %p49_p4 = pnand %p48_p3, %p42_p0 }
  0x75   :  { %v17_v2 = vpop.permute.xlu0 %16 }
  0x76   :  { %v20_v3 = vsel %vm19_vm0, %v14_v0, %v17_v2 }
  0x77   :  { %v22_v4 = vadd.f32 %v21_v1, %v20_v3 }
  0x79   :  { %24 = vst.msk [vmem:[#allocation4] sm:$0xff] %vm23_vm1, %v22_v4 }
  0x7a   :  { %52 = shalt.err (!%p49_p4)
}
  0x7b   :  { %34 = dma.vmem_to_hbm [thread:$0]  %s32_s17, 128, %s97_s3, [#allocation5]  }
  0x7c   :  { %61 = dma.done.wait [#allocation5], 128  }
  0x7d   :  { %62 = vsyncadd [#allocation5], 4294967168 }
  0x7e   :  { %38 = vsyncpa [#allocation5], 1 }

</bundles_post_ra>
